<compile_context>
chip_gen: v7x
topology: tpu7x:2x2x1
jax: 0.10.0
libtpu: 0.0.40
codegen_flags: <defaults>
</compile_context>

<pallas_src>
import math

import jax
import jax.numpy as jnp
from jax.experimental import pallas as pl
from jax.experimental.pallas import tpu as pltpu


def _build_pe(d_model: int, max_len: int, dtype=jnp.float32) -> jnp.ndarray:
    """Deterministic sinusoidal table, identical to the PyTorch __init__."""
    position = jnp.arange(max_len, dtype=jnp.float32)[:, None]            # (max_len, 1)
    div_term = jnp.exp(
        jnp.arange(0, d_model, 2, dtype=jnp.float32)
        * (-math.log(10000.0) / d_model)
    )                                                                      # (d_model//2,)
    pe = jnp.zeros((max_len, d_model), dtype=jnp.float32)
    pe = pe.at[:, 0::2].set(jnp.sin(position * div_term))
    pe = pe.at[:, 1::2].set(jnp.cos(position * div_term))
    return pe.astype(dtype)


def _add_pe_kernel(x_ref, pe_ref, o_ref):
    # x_ref/o_ref: (b_blk, tile_n)  pe_ref: (1, tile_n)
    # Pure per-vreg VPU add; pe row broadcast over the batch rows (sublanes).
    o_ref[...] = (x_ref[...] + pe_ref[...]).astype(o_ref.dtype)


def _choose_tile_n(n: int, max_tile: int) -> int:
    """Largest multiple-of-128 divisor of n that is <= max_tile, else n (full axis)."""
    if n <= max_tile:
        return n
    t = (max_tile // 128) * 128
    while t >= 128:
        if n % t == 0:
            return t
        t -= 128
    # No lane-aligned divisor (e.g. S*D not a multiple of 128): fall back to a
    # single full-width block.  TODO(synk): 3-D (b, S_tile, D) fallback tiling for
    # adversarial S*D that is both huge and not 128-aligned.
    return n


@jax.jit
def positional_encoding_forward(x: jnp.ndarray, pe: jnp.ndarray) -> jnp.ndarray:
    """x: (B, S, D);  pe: (max_len, D) with max_len >= S.  Returns x + pe[:S]."""
    B, S, D = x.shape
    max_len = pe.shape[0]
    assert max_len >= S, f"max_len ({max_len}) must be >= sequence length ({S})"

    N = S * D
    # Flatten to a lane-dense trailing axis; pre-cast pe to x.dtype (no in-kernel
    # mixed-precision add).  The pe slice/reshape is tiny table glue.
    x2 = x.reshape(B, N)
    pe_row = pe[:S].astype(x.dtype).reshape(1, N)

    # Batch rows per block (sublane dim): 8 if it tiles evenly, else the full
    # batch (a full-dim block is always layout-legal).
    b_blk = 8 if (B % 8 == 0) else B

    # Cap the x/out block at ~1 MiB so double-buffering x, pe and out stays well
    # under the default scoped VMEM on every TPU generation (incl. v7x's 64 MiB).
    itemsize = jnp.dtype(x.dtype).itemsize
    budget_bytes = 1 << 20
    max_tile = max(128, (budget_bytes // (b_blk * itemsize)) // 128 * 128)
    tile_n = _choose_tile_n(N, max_tile)

    grid = (B // b_blk, N // tile_n)

    out2 = pl.pallas_call(
        _add_pe_kernel,
        out_shape=jax.ShapeDtypeStruct((B, N), x.dtype),
        grid_spec=pltpu.PrefetchScalarGridSpec(
            num_scalar_prefetch=0,
            grid=grid,
            in_specs=[
                pl.BlockSpec((b_blk, tile_n), lambda b, t: (b, t)),  # x tile
                pl.BlockSpec((1, tile_n), lambda b, t: (0, t)),      # shared pe tile
            ],
            out_specs=pl.BlockSpec((b_blk, tile_n), lambda b, t: (b, t)),
        ),
        compiler_params=pltpu.CompilerParams(
            # Both axes independent -> shard across TensorCores on v7x megacore.
            dimension_semantics=("parallel", "parallel"),
        ),
        # Result may be written in place over x (pure x += pe).
        input_output_aliases={0: 0},
    )(x2, pe_row)

    return out2.reshape(B, S, D)


if __name__ == "__main__":
    # Small shapes consistent with the module: batch=2, seq=8, d_model=32.
    B, S, D, MAX_LEN = 2, 8, 32, 16

    key = jax.random.PRNGKey(0)
    x = jax.random.normal(key, (B, S, D), dtype=jnp.float32)
    pe = _build_pe(D, MAX_LEN, dtype=jnp.float32)

    # Pure-JAX reference (computed first, before any aliasing of x's buffer).
    ref = x + pe[:S][None, :, :]

    out = positional_encoding_forward(x, pe)
    out = jax.block_until_ready(out)

    assert out.shape == (B, S, D)
    assert jnp.allclose(out, ref, atol=1e-6), "mismatch vs reference"

    print("KERNEL_OK")
</pallas_src>

<mosaic_0001>
module attributes {stable_mosaic.version = 11 : i64} {
  func.func @_add_pe_kernel(%arg0: i32, %arg1: i32, %arg2: memref<2x256xf32, #tpu.memory_space<vmem>>, %arg3: memref<1x256xf32, #tpu.memory_space<vmem>>, %arg4: memref<2x256xf32, #tpu.memory_space<vmem>>) attributes {dimension_semantics = [#tpu.dimension_semantics<parallel>, #tpu.dimension_semantics<parallel>], iteration_bounds = array<i64: 1, 1>, scalar_prefetch = 0 : i64, scratch_operands = 0 : i64, tpu.core_type = #tpu.core_type<tc>, window_params = [{transform_indices = @transform_0, window_bounds = array<i64: 2, 256>}, {transform_indices = @transform_1, window_bounds = array<i64: 1, 256>}, {transform_indices = @transform_2, window_bounds = array<i64: 2, 256>}]} {
    %c0 = arith.constant 0 : index
    %c0_0 = arith.constant 0 : index
    %0 = vector.load %arg2[%c0, %c0_0] : memref<2x256xf32, #tpu.memory_space<vmem>>, vector<2x256xf32>
    %c0_1 = arith.constant 0 : index
    %c0_2 = arith.constant 0 : index
    %1 = vector.load %arg3[%c0_1, %c0_2] : memref<1x256xf32, #tpu.memory_space<vmem>>, vector<1x256xf32>
    %2 = vector.broadcast %1 : vector<1x256xf32> to vector<2x256xf32>
    %3 = arith.addf %0, %2 : vector<2x256xf32>
    %c0_3 = arith.constant 0 : index
    %c0_4 = arith.constant 0 : index
    %4 = vector.load %arg4[%c0_3, %c0_4] : memref<2x256xf32, #tpu.memory_space<vmem>>, vector<2x256xf32>
    tpu.vector_store %arg4[%c0_3, %c0_4], %3 {strides = array<i32>} : memref<2x256xf32, #tpu.memory_space<vmem>>, vector<2x256xf32>,
    return
  }
  func.func @transform_0(%arg0: i32, %arg1: i32) -> (i32, i32) {
    %c0_i32 = arith.constant 0 : i32
    return %arg0, %arg1 : i32, i32
  }
  func.func @transform_1(%arg0: i32, %arg1: i32) -> (i32, i32) {
    %c0_i32 = arith.constant 0 : i32
    %c0_i32_0 = arith.constant 0 : i32
    return %c0_i32, %arg1 : i32, i32
  }
  func.func @transform_2(%arg0: i32, %arg1: i32) -> (i32, i32) {
    %c0_i32 = arith.constant 0 : i32
    return %arg0, %arg1 : i32, i32
  }
}

</mosaic_0001>

<bundles_post_ra>
// kernel: positional_encoding_forward.1
= control target key start
LH: loop header
LB: loop body
LE: loop exit
PB: predicated region body
PF: predicated region fallthrough
CT: control target
= control target key end

     0   :  { %v14_v0 = vlaneseq  ;;  %v38_v1 = vmov 1983009808   ;;  %s63_s1 = inlined_call_operand.vmem [shape: f32[1,256], index: 1, kind: input, shape index: {}]   ;;  %s64_s0 = inlined_call_operand.vmem [shape: f32[2,256], index: 0, kind: input, shape index: {}, may-alias: {0,2}]   ;;  %s65_s2 = inlined_call_operand.vmem [shape: f32[2,256], index: 2, kind: output, shape index: {}, may-alias: {0,2}]  }
   0x1   :  { %v24_v2 = vunpack.c.l.s4 %v38_v1  ;;  %v12_v4 = vld [vmem:[%s63_s1] sm:$0x3] }
   0x2   :  { %v15_v3 = vshrl.u32 %v14_v0, 7  ;;  %v11_v12 = vld [vmem:[%s64_s0] sm:$0xf] }
   0x3   :  { %v25_v5 = vunpack.c.0.s8 %v24_v2 }
   0x4   :  { %v16_v6 = vsub.s32 0, %v15_v3  ;;  %v20_v7 = vsub.s32 1, %v15_v3 }
   0x5   :  { %v28_v10 = vsub.s32 %v25_v5, %v15_v3 }
   0x6   :  { %v17_v8 = vrot.slane %v12_v4, %v16_v6  ;;  %v21_v9 = vrot.slane %v12_v4, %v20_v7 }
   0x8   :  { %v22_v11 = vcombine.low %v17_v8, %v21_v9 }
   0xa   :  { %v29_v13 = vrot.slane %v22_v11, %v28_v10 }
   0xc   :  { %v31_v14 = vadd.f32 %v29_v13, %v11_v12 }
   0xe   :  { %32 = vst [vmem:[%s65_s2] sm:$0xf] %v31_v14 }

</bundles_post_ra>
